<compile_context>
chip_gen: v7x
topology: tpu7x:2x2x1
jax: 0.10.0
libtpu: 0.0.40
codegen_flags: <defaults>
</compile_context>

<pallas_src>
import math

import jax
import jax.numpy as jnp
from jax import lax
from jax.experimental import pallas as pl
from jax.experimental.pallas import tpu as pltpu

_MIB = 1024 * 1024

# (B, I) x (O, I) -> (B, O): contract last dims of both operands (no transpose).
_CONTRACT_LAST = (((1,), (1,)), ((), ()))


# -----------------------------------------------------------------------------
# Kernels
# -----------------------------------------------------------------------------

def _train_kernel(x_ref, wm_ref, wls_ref, weps_ref, bm_ref, bls_ref, beps_ref,
                  o_ref, acc_ref):
    """Sampled-weight forward: w = mu + exp(log_sigma)*eps; y = x w^T + b."""
    k = pl.program_id(1)

    @pl.when(k == 0)
    def _():
        acc_ref[...] = jnp.zeros_like(acc_ref)

    f32 = jnp.float32
    w = (wm_ref[...].astype(f32)
         + jnp.exp(wls_ref[...].astype(f32)) * weps_ref[...].astype(f32))
    acc_ref[...] += lax.dot_general(
        x_ref[...].astype(f32), w, _CONTRACT_LAST,
        precision=lax.Precision.HIGHEST,          # mem-bound at small B; passes are hidden
        preferred_element_type=f32)

    @pl.when(k == pl.num_programs(1) - 1)
    def _():
        b = (bm_ref[...].astype(f32)
             + jnp.exp(bls_ref[...].astype(f32)) * beps_ref[...].astype(f32))
        o_ref[...] = (acc_ref[...] + b).astype(o_ref.dtype)


def _eval_kernel(x_ref, wm_ref, bm_ref, o_ref, acc_ref):
    """Mean-only forward (train=False): touches only the mean parameters."""
    k = pl.program_id(1)

    @pl.when(k == 0)
    def _():
        acc_ref[...] = jnp.zeros_like(acc_ref)

    f32 = jnp.float32
    acc_ref[...] += lax.dot_general(
        x_ref[...].astype(f32), wm_ref[...].astype(f32), _CONTRACT_LAST,
        precision=lax.Precision.HIGHEST,
        preferred_element_type=f32)

    @pl.when(k == pl.num_programs(1) - 1)
    def _():
        o_ref[...] = (acc_ref[...] + bm_ref[...].astype(f32)).astype(o_ref.dtype)


# -----------------------------------------------------------------------------
# Chip-aware tiling
# -----------------------------------------------------------------------------

def _vmem_capacity_bytes():
    try:
        info = pltpu.get_tpu_info()
        cap = getattr(info, "vmem_capacity_bytes", None)
        if cap:
            return int(cap)
    except Exception:
        pass
    return 64 * _MIB  # conservative default (v7x per-TC VMEM)


def _vmem_limit_bytes(cap):
    if cap >= 100 * _MIB:
        return 100 * _MIB          # v5e / v6e: 128 MiB physical
    return int(0.72 * cap)         # v7x: 64 MiB physical -> ~46 MiB


def _choose_tiling(B, O, I, n_weight_like, w_itemsize, budget_bytes):
    """Pick (tile_o, tile_i) so double-buffered tiles + temporaries fit VMEM."""
    if O <= 128:
        tile_o_cands = [O]
    else:
        tile_o_cands = [512, 256, 128]
        # Prefer >=2 O tiles so the "parallel" axis feeds both v7x TensorCores.
        multi = [c for c in tile_o_cands if pl.cdiv(O, c) >= 2]
        tile_o_cands = multi or tile_o_cands

    # The contraction dim must never be a partially covered block (garbage in
    # I would corrupt real outputs) -> only exact divisors, else full extent.
    if I % 128 != 0:
        tile_i_cands = [I]
    else:
        tile_i_cands = sorted({c for c in (I, 4096, 2048, 1024, 512)
                               if c <= I and I % c == 0}, reverse=True)

    for to in tile_o_cands:
        for ti in tile_i_cands:
            need = (n_weight_like * 2 * w_itemsize * to * ti  # double-buffered weight-like tiles
                    + 3 * 4 * to * ti                         # f32 temporaries (exp, sampled w)
                    + 2 * 4 * B * ti                          # x tile (double-buffered)
                    + 3 * 4 * B * to                          # output (2x) + f32 accumulator
                    + 6 * 4 * to)                             # bias tiles
            if need <= budget_bytes:
                return to, ti
    return tile_o_cands[-1], tile_i_cands[-1]


# -----------------------------------------------------------------------------
# Wrapper
# -----------------------------------------------------------------------------

def bayesian_linear_forward(x, weight_mean, weight_log_sigma,
                            bias_mean, bias_log_sigma, *,
                            train=True, rng_key=None, noise=None):
    """Pallas implementation of BayesianLinear.forward.

    x:                (..., in_features)
    weight_mean:      (out_features, in_features)   (f32 or bf16)
    weight_log_sigma: (out_features, in_features)
    bias_mean:        (out_features,)
    bias_log_sigma:   (out_features,)

    train=True samples weight = mu + exp(log_sigma) * eps with eps ~ N(0, 1),
    drawn from `rng_key` unless explicit `noise=(w_eps, b_eps)` is supplied.
    Returns (..., out_features).
    """
    O, I = weight_mean.shape
    lead = x.shape[:-1]
    x2 = x.reshape(-1, I)
    B = x2.shape[0]
    out_dtype = jnp.result_type(x.dtype, weight_mean.dtype)

    cap = _vmem_capacity_bytes()
    vmem_limit = _vmem_limit_bytes(cap)
    w_itemsize = jnp.dtype(weight_mean.dtype).itemsize
    n_weight_like = 3 if train else 1
    tile_o, tile_i = _choose_tiling(B, O, I, n_weight_like, w_itemsize,
                                    int(0.8 * vmem_limit))
    n_o = pl.cdiv(O, tile_o)
    n_i = pl.cdiv(I, tile_i)

    params = pltpu.CompilerParams(
        dimension_semantics=("parallel", "arbitrary"),
        vmem_limit_bytes=vmem_limit)

    bm2 = bias_mean.reshape(1, O)

    if not train:
        cost = pl.CostEstimate(
            flops=2 * B * O * I,
            transcendentals=0,
            bytes_accessed=int(w_itemsize * O * I
                               + 4 * (n_o * B * I + B * O + O)))
        y = pl.pallas_call(
            _eval_kernel,
            out_shape=jax.ShapeDtypeStruct((B, O), out_dtype),
            grid=(n_o, n_i),
            in_specs=[
                pl.BlockSpec((B, tile_i), lambda j, k: (0, k)),        # x
                pl.BlockSpec((tile_o, tile_i), lambda j, k: (j, k)),   # weight_mean
                pl.BlockSpec((1, tile_o), lambda j, k: (0, j)),        # bias_mean
            ],
            out_specs=pl.BlockSpec((B, tile_o), lambda j, k: (0, j)),
            scratch_shapes=[pltpu.VMEM((B, tile_o), jnp.float32)],
            compiler_params=params,
            cost_estimate=cost,
        )(x2, weight_mean, bm2)
        return y.reshape(*lead, O)

    # train=True: sampled weights.
    if noise is None:
        if rng_key is None:
            raise ValueError("train=True requires rng_key or noise=(w_eps, b_eps)")
        kw, kb = jax.random.split(rng_key)
        w_eps = jax.random.normal(kw, (O, I), dtype=jnp.float32)
        b_eps = jax.random.normal(kb, (O,), dtype=jnp.float32)
    else:
        w_eps, b_eps = noise
    beps2 = b_eps.reshape(1, O)
    bls2 = bias_log_sigma.reshape(1, O)

    cost = pl.CostEstimate(
        flops=2 * B * O * I,
        transcendentals=O * I + O,
        bytes_accessed=int((2 * w_itemsize + 4) * O * I      # mu, log_sigma, eps
                           + 4 * (n_o * B * I + B * O + 3 * O)))

    y = pl.pallas_call(
        _train_kernel,
        out_shape=jax.ShapeDtypeStruct((B, O), out_dtype),
        grid=(n_o, n_i),
        in_specs=[
            pl.BlockSpec((B, tile_i), lambda j, k: (0, k)),          # x
            pl.BlockSpec((tile_o, tile_i), lambda j, k: (j, k)),     # weight_mean
            pl.BlockSpec((tile_o, tile_i), lambda j, k: (j, k)),     # weight_log_sigma
            pl.BlockSpec((tile_o, tile_i), lambda j, k: (j, k)),     # w_eps
            pl.BlockSpec((1, tile_o), lambda j, k: (0, j)),          # bias_mean
            pl.BlockSpec((1, tile_o), lambda j, k: (0, j)),          # bias_log_sigma
            pl.BlockSpec((1, tile_o), lambda j, k: (0, j)),          # b_eps
        ],
        out_specs=pl.BlockSpec((B, tile_o), lambda j, k: (0, j)),
        scratch_shapes=[pltpu.VMEM((B, tile_o), jnp.float32)],
        compiler_params=params,
        cost_estimate=cost,
    )(x2, weight_mean, weight_log_sigma, w_eps, bm2, bls2, beps2)
    return y.reshape(*lead, O)


def init_bayesian_linear_params(key, in_features, out_features):
    """Deterministic init mirroring the PyTorch __init__."""
    init_std = 1.0 / math.sqrt(in_features)
    kw, kb = jax.random.split(key)
    weight_mean = jax.random.uniform(
        kw, (out_features, in_features), minval=-init_std, maxval=init_std,
        dtype=jnp.float32)
    weight_log_sigma = jnp.full((out_features, in_features),
                                math.log(init_std), dtype=jnp.float32)
    bias_mean = jax.random.uniform(
        kb, (out_features,), minval=-init_std, maxval=init_std,
        dtype=jnp.float32)
    bias_log_sigma = jnp.full((out_features,), math.log(init_std),
                              dtype=jnp.float32)
    return weight_mean, weight_log_sigma, bias_mean, bias_log_sigma


if __name__ == "__main__":
    key = jax.random.PRNGKey(0)
    k_param, k_data, k_noise = jax.random.split(key, 3)

    # Deliberately unaligned logical sizes (no wrapper padding is performed):
    # O=200 -> 2 O-tiles (one partial edge tile), I=40 stays full-extent.
    batch, in_features, out_features = 4, 40, 200

    wm, wls, bm, bls = init_bayesian_linear_params(k_param, in_features, out_features)
    x = jax.random.normal(k_data, (batch, in_features), dtype=jnp.float32)

    hi = jax.lax.Precision.HIGHEST

    # ---- train=True with explicit noise (so we can check exact numerics) ----
    kw, kb = jax.random.split(k_noise)
    w_eps = jax.random.normal(kw, (out_features, in_features), dtype=jnp.float32)
    b_eps = jax.random.normal(kb, (out_features,), dtype=jnp.float32)

    y_train = bayesian_linear_forward(x, wm, wls, bm, bls, train=True,
                                      noise=(w_eps, b_eps))
    y_train = jax.block_until_ready(y_train)

    w_s = wm + jnp.exp(wls) * w_eps
    b_s = bm + jnp.exp(bls) * b_eps
    y_ref = jnp.dot(x, w_s.T, precision=hi) + b_s
    assert y_train.shape == (batch, out_features)
    assert jnp.allclose(y_train, y_ref, atol=2e-5, rtol=2e-5), \
        float(jnp.max(jnp.abs(y_train - y_ref)))

    # ---- train=True with rng_key (noise drawn like torch.randn_like) --------
    y_rng = bayesian_linear_forward(x, wm, wls, bm, bls, train=True,
                                    rng_key=k_noise)
    y_rng2 = bayesian_linear_forward(x, wm, wls, bm, bls, train=True,
                                     rng_key=k_noise)
    y_rng, y_rng2 = jax.block_until_ready((y_rng, y_rng2))
    assert bool(jnp.all(jnp.isfinite(y_rng)))
    assert bool(jnp.all(y_rng == y_rng2))        # deterministic per key

    # ---- train=False: mean-only kernel --------------------------------------
    y_eval = bayesian_linear_forward(x, wm, wls, bm, bls, train=False)
    y_eval = jax.block_until_ready(y_eval)
    y_eval_ref = jnp.dot(x, wm.T, precision=hi) + bm
    assert jnp.allclose(y_eval, y_eval_ref, atol=2e-5, rtol=2e-5), \
        float(jnp.max(jnp.abs(y_eval - y_eval_ref)))

    print("KERNEL_OK")
</pallas_src>

<mosaic_0001>
module attributes {stable_mosaic.version = 11 : i64} {
  func.func @_train_kernel(%arg0: i32, %arg1: i32, %arg2: memref<4x40xf32, #tpu.memory_space<vmem>>, %arg3: memref<128x40xf32, #tpu.memory_space<vmem>>, %arg4: memref<128x40xf32, #tpu.memory_space<vmem>>, %arg5: memref<128x40xf32, #tpu.memory_space<vmem>>, %arg6: memref<1x128xf32, #tpu.memory_space<vmem>>, %arg7: memref<1x128xf32, #tpu.memory_space<vmem>>, %arg8: memref<1x128xf32, #tpu.memory_space<vmem>>, %arg9: memref<4x128xf32, #tpu.memory_space<vmem>>, %arg10: memref<4x128xf32, #tpu.memory_space<vmem>>) attributes {dimension_semantics = [#tpu.dimension_semantics<parallel>, #tpu.dimension_semantics<arbitrary>], iteration_bounds = array<i64: 2, 1>, scalar_prefetch = 0 : i64, scratch_operands = 1 : i64, tpu.core_type = #tpu.core_type<tc>, window_params = [{transform_indices = @transform_0, window_bounds = array<i64: 4, 40>}, {transform_indices = @transform_1, window_bounds = array<i64: 128, 40>}, {transform_indices = @transform_2, window_bounds = array<i64: 128, 40>}, {transform_indices = @transform_3, window_bounds = array<i64: 128, 40>}, {transform_indices = @transform_4, window_bounds = array<i64: 1, 128>}, {transform_indices = @transform_5, window_bounds = array<i64: 1, 128>}, {transform_indices = @transform_6, window_bounds = array<i64: 1, 128>}, {transform_indices = @transform_7, window_bounds = array<i64: 4, 128>}]} {
    %c0_i32 = arith.constant 0 : i32
    %0 = arith.cmpi eq, %arg1, %c0_i32 : i32
    %1 = arith.extui %0 : i1 to i32
    %c0_i32_0 = arith.constant 0 : i32
    %2 = arith.cmpi ne, %1, %c0_i32_0 : i32
    scf.if %2 {
      %cst_14 = arith.constant 0.000000e+00 : f32
      %17 = vector.broadcast %cst_14 : f32 to vector<4x128xf32>
      %c0_15 = arith.constant 0 : index
      %c0_16 = arith.constant 0 : index
      %18 = vector.load %arg10[%c0_15, %c0_16] : memref<4x128xf32, #tpu.memory_space<vmem>>, vector<4x128xf32>
      tpu.vector_store %arg10[%c0_15, %c0_16], %17 {strides = array<i32>} : memref<4x128xf32, #tpu.memory_space<vmem>>, vector<4x128xf32>,
    } else {
    }
    %c0 = arith.constant 0 : index
    %c0_1 = arith.constant 0 : index
    %3 = vector.load %arg3[%c0, %c0_1] : memref<128x40xf32, #tpu.memory_space<vmem>>, vector<128x40xf32>
    %c0_2 = arith.constant 0 : index
    %c0_3 = arith.constant 0 : index
    %4 = vector.load %arg4[%c0_2, %c0_3] : memref<128x40xf32, #tpu.memory_space<vmem>>, vector<128x40xf32>
    %5 = math.exp %4 : vector<128x40xf32>
    %c0_4 = arith.constant 0 : index
    %c0_5 = arith.constant 0 : index
    %6 = vector.load %arg5[%c0_4, %c0_5] : memref<128x40xf32, #tpu.memory_space<vmem>>, vector<128x40xf32>
    %7 = arith.mulf %5, %6 : vector<128x40xf32>
    %8 = arith.addf %3, %7 : vector<128x40xf32>
    %c0_6 = arith.constant 0 : index
    %c0_7 = arith.constant 0 : index
    %9 = vector.load %arg10[%c0_6, %c0_7] : memref<4x128xf32, #tpu.memory_space<vmem>>, vector<4x128xf32>
    %c0_8 = arith.constant 0 : index
    %c0_9 = arith.constant 0 : index
    %10 = vector.load %arg2[%c0_8, %c0_9] : memref<4x40xf32, #tpu.memory_space<vmem>>, vector<4x40xf32>
    %cst = arith.constant dense<0.000000e+00> : vector<4x128xf32>
    %11 = tpu.matmul %10, %8, %cst {dimension_numbers = #tpu.dot_dimension_numbers<[1], [1], [0], [0], [0, 0, 1, 0], [], []>, precision = #tpu.contract_precision<fp32>} : vector<4x40xf32>, vector<128x40xf32>, vector<4x128xf32> -> vector<4x128xf32>
    %12 = arith.addf %9, %11 : vector<4x128xf32>
    %c0_10 = arith.constant 0 : index
    %c0_11 = arith.constant 0 : index
    %13 = vector.load %arg10[%c0_10, %c0_11] : memref<4x128xf32, #tpu.memory_space<vmem>>, vector<4x128xf32>
    tpu.vector_store %arg10[%c0_10, %c0_11], %12 {strides = array<i32>} : memref<4x128xf32, #tpu.memory_space<vmem>>, vector<4x128xf32>,
    %c0_i32_12 = arith.constant 0 : i32
    %14 = arith.cmpi eq, %arg1, %c0_i32_12 : i32
    %15 = arith.extui %14 : i1 to i32
    %c0_i32_13 = arith.constant 0 : i32
    %16 = arith.cmpi ne, %15, %c0_i32_13 : i32
    scf.if %16 {
      %c0_14 = arith.constant 0 : index
      %c0_15 = arith.constant 0 : index
      %17 = vector.load %arg6[%c0_14, %c0_15] : memref<1x128xf32, #tpu.memory_space<vmem>>, vector<1x128xf32>
      %c0_16 = arith.constant 0 : index
      %c0_17 = arith.constant 0 : index
      %18 = vector.load %arg7[%c0_16, %c0_17] : memref<1x128xf32, #tpu.memory_space<vmem>>, vector<1x128xf32>
      %19 = math.exp %18 : vector<1x128xf32>
      %c0_18 = arith.constant 0 : index
      %c0_19 = arith.constant 0 : index
      %20 = vector.load %arg8[%c0_18, %c0_19] : memref<1x128xf32, #tpu.memory_space<vmem>>, vector<1x128xf32>
      %21 = arith.mulf %19, %20 : vector<1x128xf32>
      %22 = arith.addf %17, %21 : vector<1x128xf32>
      %c0_20 = arith.constant 0 : index
      %c0_21 = arith.constant 0 : index
      %23 = vector.load %arg10[%c0_20, %c0_21] : memref<4x128xf32, #tpu.memory_space<vmem>>, vector<4x128xf32>
      %24 = vector.broadcast %22 : vector<1x128xf32> to vector<4x128xf32>
      %25 = arith.addf %23, %24 : vector<4x128xf32>
      %c0_22 = arith.constant 0 : index
      %c0_23 = arith.constant 0 : index
      %26 = vector.load %arg9[%c0_22, %c0_23] : memref<4x128xf32, #tpu.memory_space<vmem>>, vector<4x128xf32>
      tpu.vector_store %arg9[%c0_22, %c0_23], %25 {strides = array<i32>} : memref<4x128xf32, #tpu.memory_space<vmem>>, vector<4x128xf32>,
    } else {
    }
    return
  }
  func.func @transform_0(%arg0: i32, %arg1: i32) -> (i32, i32) {
    %c0_i32 = arith.constant 0 : i32
    %c0_i32_0 = arith.constant 0 : i32
    return %c0_i32, %arg1 : i32, i32
  }
  func.func @transform_1(%arg0: i32, %arg1: i32) -> (i32, i32) {
    %c0_i32 = arith.constant 0 : i32
    return %arg0, %arg1 : i32, i32
  }
  func.func @transform_2(%arg0: i32, %arg1: i32) -> (i32, i32) {
    %c0_i32 = arith.constant 0 : i32
    return %arg0, %arg1 : i32, i32
  }
  func.func @transform_3(%arg0: i32, %arg1: i32) -> (i32, i32) {
    %c0_i32 = arith.constant 0 : i32
    return %arg0, %arg1 : i32, i32
  }
  func.func @transform_4(%arg0: i32, %arg1: i32) -> (i32, i32) {
    %c0_i32 = arith.constant 0 : i32
    %c0_i32_0 = arith.constant 0 : i32
    return %c0_i32, %arg0 : i32, i32
  }
  func.func @transform_5(%arg0: i32, %arg1: i32) -> (i32, i32) {
    %c0_i32 = arith.constant 0 : i32
    %c0_i32_0 = arith.constant 0 : i32
    return %c0_i32, %arg0 : i32, i32
  }
  func.func @transform_6(%arg0: i32, %arg1: i32) -> (i32, i32) {
    %c0_i32 = arith.constant 0 : i32
    %c0_i32_0 = arith.constant 0 : i32
    return %c0_i32, %arg0 : i32, i32
  }
  func.func @transform_7(%arg0: i32, %arg1: i32) -> (i32, i32) {
    %c0_i32 = arith.constant 0 : i32
    %c0_i32_0 = arith.constant 0 : i32
    return %c0_i32, %arg0 : i32, i32
  }
}

</mosaic_0001>

<bundles_post_ra>
// kernel: tpu_custom_call.1
= control target key start
LH: loop header
LB: loop body
LE: loop exit
PB: predicated region body
PF: predicated region fallthrough
CT: control target
= control target key end

     0   :  { %12 = vsyncpa [#allocation4], 0  ;;  %s2615_s0 = inlined_call_operand.vmem [shape: f32[4,40], index: 0, kind: input, shape index: {}]   ;;  %s2616_s1 = inlined_call_operand.vmem [shape: f32[200,40], index: 1, kind: input, shape index: {}]   ;;  %s2617_s2 = inlined_call_operand.vmem [shape: f32[200,40], index: 2, kind: input, shape index: {}]   ;;  %s2618_s3 = inlined_call_operand.vmem [shape: f32[200,40], index: 3, kind: input, shape index: {}]   ;;  %s2619_s4 = inlined_call_operand.vmem [shape: f32[1,200], index: 4, kind: input, shape index: {}]   ;;  %s2620_s5 = inlined_call_operand.vmem [shape: f32[1,200], index: 5, kind: input, shape index: {}]   ;;  %s2621_s6 = inlined_call_operand.vmem [shape: f32[1,200], index: 6, kind: input, shape index: {}]   ;;  %s2622_s7 = inlined_call_operand.hbm [shape: f32[4,200], index: 7, kind: output, shape index: {}]  }
   0x1   :  { %14 = vsyncpa [#allocation4 + $0x1], 0  ;;  %s2165_s24 = smov 0   ;;  %s2167_s25 = smov 0  }
   0x2   :  { %s2169_s26 = smov 0   ;;  %s2171_s27 = smov 0  }
   0x3   :  { %s2173_s28 = smov 0   ;;  %s2175_s29 = smov 0  }
   0x4 LB: > { %s1476_s30 = sadd.s32 4294967295, %s2119_s29   ;;  %s1477_s8 = sadd.s32 4294967294, %s2119_s29   ;;  %s2119_s29 = sphi %s2175_s29, %s20_s29   ;;  %s2115_s28 = sphi %s2173_s28, %s2629_s28   ;;  %s2111_s27 = sphi %s2171_s27, %s2628_s27   ;;  %s2107_s26 = sphi %s2169_s26, %s2627_s26   ;;  %s2103_s25 = sphi %s2167_s25, %s2626_s25   ;;  %s2099_s24 = sphi %s2165_s24, %s2625_s24  }
   0x5   : > { %s32_s9 = sadd.s32 1, %s2115_s28  ;;  %s227_s10 = sadd.s32 1, %s2107_s26 }
   0x6   : > { %p34_p0 = scmp.ge.s32.totalorder %s32_s9, 2  ;;  %p237_p1 = scmp.ne.s32.totalorder %s2107_s26, %s2103_s25 }
   0x7   : > { %p238_p2 = scmp.eq.s32.totalorder %s1476_s30, 1  ;;  %p243_p3 = scmp.ne.s32.totalorder %s2103_s25, %s2099_s24 }
   0x8   : > { %s2631_s9 = smov (%p34_p0, %s32_s9), 0  ;;  %p244_p5 = scmp.eq.s32.totalorder %s1477_s8, 1 }
   0x9   : > { %p2205_p4 = por %p238_p2, %p237_p1  ;;  %s224_s12 = ssub.s32 %s2115_s28, %s2631_s9 }
   0xa   : > { %p1481_p6 = scmp.ge.s32.totalorder %s2119_s29, 1  ;;  %p225_p7 = scmp.eq.s32.totalorder %s224_s12, 0 }
   0xb   : > { %p2212_p8 = por %p244_p5, %p243_p3  ;;  %p347_p9 = scmp.lt.s32.totalorder %s2119_s29, 3 }
   0xc   : > { %s2218_s14 = scalar_select %p225_p7, %s2107_s26, %s227_s10  }
   0xd   : > { %p348_p10 = pnand %p1481_p6, %p347_p9 }
   0xe   : > { %s1483_s15 = sshll.u32 (!%p348_p10), %s2111_s27, 4  ;;  %v2121_v0 = vmov (!%p348_p10), 0.0|0.0   ;;  %v2122_v1 = vmov (!%p348_p10), 0.0   ;;  %vm2123_vm0 = vmmov (!%p348_p10), 0   ;;  %vm606_vm1 = vcmask (!%p348_p10), 326656   ;;  %p478_p12 = scmp.lt.s32.totalorder (!%p348_p10), %s2111_s27, 1 }
   0xf   : > { %351 = sbr.rel (%p348_p10) target bundleno = 488 (0x1e8), region = 48  ;;  %1805 = vmatprep.subr.bf16.mxu0 (!%p348_p10), %v2121_v0  ;;  %p432_p11 = scmp.lt.s32.totalorder (!%p348_p10), %s1483_s15, 24  ;;  %1829 = vmatprep.subr.bf16.mxu1 (!%p348_p10), %v2121_v0  ;;  %491 = vst [vmem:[#allocation2] sm:$0xf] (!%p348_p10), %v2122_v1 }
  0x10   : > { %1627 = vmatprep.mubr.msk.f32.mxu0 (!%p348_p10), %vm2123_vm0, %v2122_v1  ;;  %1662 = vmatprep.mubr.msk.f32.mxu1 (!%p348_p10), %vm2123_vm0, %v2122_v1  ;;  %s1490_s12 = sshll.u32 (!%p348_p10), %s2111_s27, 6 }
  0x16   : > { %s2633_s15 = smov (!%p432_p11, %s1483_s15), 24 }
  0x17   : > { %s1484_s16 = sshll.u32 %s2633_s15, 3 }
  0x18   : > { %s2231_s19 = scalar_lea.vmem %s2617_s2, %s1484_s16  ;;  %s2244_s22 = scalar_lea.vmem %s2618_s3, %s1484_s16 }
  0x19   : > { %v508_v2 = vld [vmem:[%s2231_s19] sm:$0xff]  ;;  %v509_v3 = vld [vmem:[%s2231_s19 + $0x8] sm:$0xff]  ;;  %v510_v6 = vld [vmem:[%s2231_s19 + $0x10] sm:$0xff]  ;;  %s2251_s8 = scalar_lea.vmem %s2616_s1, %s1484_s16 }
  0x1a   : > { %v524_v4 = vmul.f32 1.442695, %v508_v2  ;;  %v526_v5 = vmul.f32 1.442695, %v509_v3  ;;  %v511_v7 = vld [vmem:[%s2231_s19 + $0x18] sm:$0xff]  ;;  %v512_v10 = vld [vmem:[%s2231_s19 + $0x20] sm:$0xff] }
  0x1b   : > { %v528_v8 = vmul.f32 1.442695, %v510_v6  ;;  %v530_v9 = vmul.f32 1.442695, %v511_v7  ;;  %v513_v11 = vld [vmem:[%s2231_s19 + $0x28] sm:$0xff]  ;;  %v514_v14 = vld [vmem:[%s2231_s19 + $0x30] sm:$0xff] }
  0x1c   : > { %2007 = vpow2.f32 %v524_v4  ;;  %v532_v12 = vmul.f32 1.442695, %v512_v10  ;;  %v534_v13 = vmul.f32 1.442695, %v513_v11  ;;  %v515_v15 = vld [vmem:[%s2231_s19 + $0x38] sm:$0xff]  ;;  %v516_v18 = vld [vmem:[%s2231_s19 + $0x40] sm:$0xff] }
  0x1d   : > { %2009 = vpow2.f32 %v526_v5  ;;  %v536_v16 = vmul.f32 1.442695, %v514_v14  ;;  %v538_v17 = vmul.f32 1.442695, %v515_v15  ;;  %v517_v19 = vld [vmem:[%s2231_s19 + $0x48] sm:$0xff]  ;;  %v518_v20 = vld [vmem:[%s2231_s19 + $0x50] sm:$0xff] }
  0x1e   : > { %2011 = vpow2.f32 %v528_v8  ;;  %v556_v21 = vld [vmem:[%s2244_s22] sm:$0xff]  ;;  %v540_v22 = vmul.f32 1.442695, %v516_v18  ;;  %v519_v23 = vld [vmem:[%s2231_s19 + $0x58] sm:$0xff]  ;;  %v557_v24 = vld [vmem:[%s2244_s22 + $0x8] sm:$0xff]  ;;  %s479_s15 = scalar_select %p478_p12, %s2111_s27, 1 }
  0x1f   : > { %2013 = vpow2.f32 %v530_v9  ;;  %v542_v25 = vmul.f32 1.442695, %v517_v19  ;;  %v492_v27 = vld [vmem:[%s2251_s8] sm:$0xff]  ;;  %v558_v28 = vld [vmem:[%s2244_s22 + $0x10] sm:$0xff]  ;;  %v544_v29 = vmul.f32 1.442695, %v518_v20 }
  0x20   : > { %2015 = vpow2.f32 %v532_v12  ;;  %v493_v31 = vld [vmem:[%s2251_s8 + $0x8] sm:$0xff]  ;;  %v559_v33 = vld [vmem:[%s2244_s22 + $0x18] sm:$0xff]  ;;  %v546_v34 = vmul.f32 1.442695, %v519_v23  ;;  %v494_v37 = vld [vmem:[%s2251_s8 + $0x10] sm:$0xff]  ;;  %s483_s18 = scalar_lea.vmem %s2620_s5, %s479_s15  ;;  %s486_s21 = scalar_lea.vmem %s2621_s6, %s479_s15 }
  0x21   : > { %2017 = vpow2.f32 %v534_v13  ;;  %v560_v38 = vld [vmem:[%s2244_s22 + $0x20] sm:$0xff]  ;;  %v495_v41 = vld [vmem:[%s2251_s8 + $0x18] sm:$0xff]  ;;  %v561_v43 = vld [vmem:[%s2244_s22 + $0x28] sm:$0xff]  ;;  %s480_s30 = scalar_lea.vmem %s2619_s4, %s479_s15  ;;  %s2124_s27 = smov [#allocation3]  }
  0x22   : > { %2019 = vpow2.f32 %v536_v16  ;;  %v496_v47 = vld [vmem:[%s2251_s8 + $0x20] sm:$0xff]  ;;  %v562_v48 = vld [vmem:[%s2244_s22 + $0x30] sm:$0xff]  ;;  %v497_v52 = vld [vmem:[%s2251_s8 + $0x28] sm:$0xff] }
  0x23   : > { %2021 = vpow2.f32 %v538_v17  ;;  %v563_v10 = vld [vmem:[%s2244_s22 + $0x38] sm:$0xff]  ;;  %v520_v11 = vld [vmem:[%s2231_s19 + $0x60] sm:$0xff]  ;;  %v521_v16 = vld [vmem:[%s2231_s19 + $0x68] sm:$0xff] }
  0x24   : > { %2023 = vpow2.f32 %v540_v22  ;;  %v498_v20 = vld [vmem:[%s2251_s8 + $0x30] sm:$0xff] }
  0x25   : > { %2025 = vpow2.f32 %v542_v25 }
  0x26   : > { %v2008_v26 = vpop.eup %2007  ;;  %2027 = vpow2.f32 %v544_v29 }
  0x27   : > { %v2010_v30 = vpop.eup %2009  ;;  %v572_v32 = vmul.f32 %v2008_v26, %v556_v21  ;;  %2029 = vpow2.f32 %v546_v34  ;;  %v499_v21 = vld [vmem:[%s2251_s8 + $0x38] sm:$0xff]  ;;  %v548_v26 = vmul.f32 1.442695, %v520_v11 }
  0x28   : > { %v2012_v35 = vpop.eup %2011  ;;  %v573_v36 = vmul.f32 %v2010_v30, %v557_v24 }
  0x29   : > { %v2014_v39 = vpop.eup %2013  ;;  %v588_v40 = vadd.f32 %v572_v32, %v492_v27  ;;  %v574_v42 = vmul.f32 %v2012_v35, %v558_v28  ;;  %v550_v32 = vmul.f32 1.442695, %v521_v16  ;;  %2031 = vpow2.f32 %v548_v26 }
  0x2a   : > { %v2016_v44 = vpop.eup %2015  ;;  %v589_v45 = vadd.f32 %v573_v36, %v493_v31  ;;  %v575_v46 = vmul.f32 %v2014_v39, %v559_v33  ;;  %v564_v31 = vld [vmem:[%s2244_s22 + $0x40] sm:$0xff] }
  0x2b   : > { %v2018_v49 = vpop.eup %2017  ;;  %v611_v50 = vsel %vm606_vm1, %v588_v40, 0  ;;  %v590_v51 = vadd.f32 %v574_v42, %v494_v37  ;;  %v576_v53 = vmul.f32 %v2016_v44, %v560_v38  ;;  %2033 = vpow2.f32 %v550_v32 }
  0x2c   : > { %v2020_v54 = vpop.eup %2019  ;;  %v614_v55 = vsel %vm606_vm1, %v589_v45, 0  ;;  %v659_v56 = vand.u32 4294901760, %v611_v50  ;;  %v591_v57 = vadd.f32 %v575_v46, %v495_v41  ;;  %v577_v58 = vmul.f32 %v2018_v49, %v561_v43  ;;  %v565_v43 = vld [vmem:[%s2244_s22 + $0x48] sm:$0xff]  ;;  %v500_v46 = vld [vmem:[%s2251_s8 + $0x40] sm:$0xff] }
  0x2d   : > { %v662_v59 = vand.u32 4294901760, %v614_v55  ;;  %v617_v60 = vsel %vm606_vm1, %v590_v51, 0  ;;  %v592_v61 = vadd.f32 %v576_v53, %v496_v47  ;;  %v578_v62 = vmul.f32 %v2020_v54, %v562_v48  ;;  %v2022_v5 = vpop.eup %2021  ;;  %v501_v51 = vld [vmem:[%s2251_s8 + $0x48] sm:$0xff] }
  0x2e   : > { %v2271_v63 = vsub.f32 %v611_v50, %v659_v56  ;;  %v620_v2 = vsel %vm606_vm1, %v591_v57, 0  ;;  %v665_v3 = vand.u32 4294901760, %v617_v60  ;;  %v593_v4 = vadd.f32 %v577_v58, %v497_v52  ;;  %v2024_v22 = vpop.eup %2023 }
  0x2f   : > { %v2274_v6 = vpack.c.bf16 %v662_v59, %v659_v56  ;;  %v2276_v7 = vsub.f32 %v614_v55, %v662_v59  ;;  %v668_v8 = vand.u32 4294901760, %v620_v2  ;;  %v2279_v9 = vsel %vm606_vm1, %v592_v61, 0  ;;  %v2026_v27 = vpop.eup %2025  ;;  %v522_v55 = vld [vmem:[%s2231_s19 + $0x70] sm:$0xff]  ;;  %v523_v59 = vld [vmem:[%s2231_s19 + $0x78] sm:$0xff]  ;;  %s2568_s19 = scalar_lea.hbm %s2622_s7, %s1490_s12 }
  0x30   : > { %v2283_v12 = vsub.f32 %v617_v60, %v665_v3  ;;  %v752_v13 = vand.u32 4294901760, %v2271_v63  ;;  %v626_v14 = vsel %vm606_vm1, %v593_v4, 0  ;;  %v671_v15 = vand.u32 4294901760, %v2279_v9  ;;  %v2028_v33 = vpop.eup %2027  ;;  %v566_v61 = vld [vmem:[%s2244_s22 + $0x50] sm:$0xff] }
  0x31   : > { %1807 = vmatpush3.bf16.xpose.msra.mxu0 %v2274_v6  ;;  %v2290_v17 = vsub.f32 %v620_v2, %v668_v8  ;;  %v759_v18 = vand.u32 4294901760, %v2276_v7  ;;  %v674_v19 = vand.u32 4294901760, %v626_v14  ;;  %v579_v25 = vmul.f32 %v2022_v5, %v563_v10  ;;  %v2030_v38 = vpop.eup %2029 }
  0x32   : > { %1808 = vmatprep.subr.bf16.mxu0 %v2121_v0  ;;  %v753_v23 = vsub.f32 %v2271_v63, %v752_v13  ;;  %v766_v24 = vand.u32 4294901760, %v2283_v12  ;;  %v2304_v29 = vsub.f32 %v2279_v9, %v671_v15  ;;  %v594_v36 = vadd.f32 %v578_v62, %v498_v20  ;;  %v567_v62 = vld [vmem:[%s2244_s22 + $0x58] sm:$0xff] }
  0x33   : > { %v760_v28 = vsub.f32 %v2276_v7, %v759_v18  ;;  %v773_v30 = vand.u32 4294901760, %v2290_v17  ;;  %v2308_v35 = vsub.f32 %v626_v14, %v674_v19  ;;  %v595_v37 = vadd.f32 %v579_v25, %v499_v21 }
  0x34   : > { %v754_v34 = vand.u32 4294901760, %v753_v23  ;;  %v2310_v39 = vpack.c.bf16 %v668_v8, %v665_v3  ;;  %v767_v41 = vsub.f32 %v2283_v12, %v766_v24  ;;  %v629_v44 = vsel %vm606_vm1, %v594_v36, 0 }
  0x35   : > { %v761_v40 = vand.u32 4294901760, %v760_v28  ;;  %v774_v42 = vsub.f32 %v2290_v17, %v773_v30  ;;  %v632_v45 = vsel %vm606_vm1, %v595_v37, 0  ;;  %v580_v47 = vmul.f32 %v2024_v22, %v564_v31  ;;  %v502_v22 = vld [vmem:[%s2251_s8 + $0x50] sm:$0xff]  ;;  %v2032_v28 = vpop.eup %2031  ;;  %v569_v37 = vld [vmem:[%s2244_s22 + $0x68] sm:$0xff] }
  0x36   : > { %v677_v49 = vand.u32 4294901760, %v629_v44  ;;  %v680_v50 = vand.u32 4294901760, %v632_v45  ;;  %v780_v52 = vand.u32 4294901760, %v2304_v29  ;;  %v787_v53 = vand.u32 4294901760, %v2308_v35  ;;  %v2034_v36 = vpop.eup %2033 }
  0x37   : > { %v1830_v48 = vpack.c.bf16 %v761_v40, %v754_v34  ;;  %v581_v54 = vmul.f32 %v2026_v27, %v565_v43  ;;  %v768_v56 = vand.u32 4294901760, %v767_v41  ;;  %v775_v57 = vand.u32 4294901760, %v774_v42  ;;  %v568_v34 = vld [vmem:[%s2244_s22 + $0x60] sm:$0xff] }
  0x38   : > { %v596_v58 = vadd.f32 %v580_v47, %v500_v46  ;;  %v2332_v2 = vsub.f32 %v629_v44, %v677_v49  ;;  %v2334_v3 = vsub.f32 %v632_v45, %v680_v50  ;;  %v552_v4 = vmul.f32 1.442695, %v522_v55 }
  0x39   : > { %1810 = vmatpush3.bf16.xpose.msra.mxu0 %v2310_v39  ;;  %1831 = vmatpush3.bf16.xpose.msra.mxu1 %v1830_v48  ;;  %v597_v60 = vadd.f32 %v581_v54, %v501_v51  ;;  %v2336_v5 = vpack.c.bf16 %v674_v19, %v671_v15  ;;  %v781_v8 = vsub.f32 %v2304_v29, %v780_v52  ;;  %v554_v10 = vmul.f32 1.442695, %v523_v59  ;;  %v503_v15 = vld [vmem:[%s2251_s8 + $0x58] sm:$0xff]  ;;  %v504_v48 = vld [vmem:[%s2251_s8 + $0x60] sm:$0xff]  ;;  %v505_v54 = vld [vmem:[%s2251_s8 + $0x68] sm:$0xff] }
  0x3a   : > { %1811 = vmatprep.subr.bf16.mxu0 %v2121_v0  ;;  %1832 = vmatprep.subr.bf16.mxu1 %v2121_v0  ;;  %v788_v9 = vsub.f32 %v2308_v35, %v787_v53  ;;  %v1833_v11 = vpack.c.bf16 %v775_v57, %v768_v56  ;;  %v635_v14 = vsel %vm606_vm1, %v596_v58, 0  ;;  %v582_v16 = vmul.f32 %v2028_v33, %v566_v61 }
  0x3b   : > { %v583_v20 = vmul.f32 %v2030_v38, %v567_v62  ;;  %v638_v21 = vsel %vm606_vm1, %v597_v60, 0  ;;  %v794_v19 = vand.u32 4294901760, %v2332_v2  ;;  %v801_v23 = vand.u32 4294901760, %v2334_v3 }
  0x3c   : > { %2035 = vpow2.f32 %v552_v4  ;;  %v782_v25 = vand.u32 4294901760, %v781_v8  ;;  %v789_v26 = vand.u32 4294901760, %v788_v9  ;;  %v683_v27 = vand.u32 4294901760, %v635_v14  ;;  %v570_v4 = vld [vmem:[%s2244_s22 + $0x70] sm:$0xff]  ;;  %v571_v8 = vld [vmem:[%s2244_s22 + $0x78] sm:$0xff]  ;;  %s2045_s22 = sshll.u32 %s2124_s27, 4  ;;  %s2046_s22 = int_to_ptr.vmem [resolvable:$false] %s2045_s22 }
  0x3d   : > { %2037 = vpow2.f32 %v554_v10  ;;  %v686_v31 = vand.u32 4294901760, %v638_v21  ;;  %v598_v32 = vadd.f32 %v582_v16, %v502_v22  ;;  %v599_v33 = vadd.f32 %v583_v20, %v503_v15  ;;  %s2047_s23 = scalar_lea.vmem %s2046_s22, 128 }
  0x3e   : > { %v795_v38 = vsub.f32 %v2332_v2, %v794_v19  ;;  %v802_v40 = vsub.f32 %v2334_v3, %v801_v23  ;;  %v2357_v41 = vpack.c.bf16 %v680_v50, %v677_v49  ;;  %v1836_v42 = vpack.c.bf16 %v789_v26, %v782_v25  ;;  %v506_v26 = vld [vmem:[%s2251_s8 + $0x70] sm:$0xff] }
  0x3f   : > { %v2359_v43 = vsub.f32 %v635_v14, %v683_v27  ;;  %v584_v44 = vmul.f32 %v2032_v28, %v568_v34  ;;  %v2361_v45 = vsub.f32 %v638_v21, %v686_v31  ;;  %v641_v46 = vsel %vm606_vm1, %v598_v32, 0  ;;  %v507_v28 = vld [vmem:[%s2251_s8 + $0x78] sm:$0xff]  ;;  %s420_s8 = sand.u32 1, %s2103_s25  }
  0x40   : > { %v644_v47 = vsel %vm606_vm1, %v599_v33, 0  ;;  %v585_v51 = vmul.f32 %v2034_v36, %v569_v37  ;;  %v796_v55 = vand.u32 4294901760, %v795_v38  ;;  %v803_v56 = vand.u32 4294901760, %v802_v40  ;;  %s1482_s10 = sshll.u32 %s420_s8, 2  ;;  %s1321_s20 = scalar_lea.sflag [#allocation4], %s420_s8 }
  0x41   : > { %1813 = vmatpush3.bf16.xpose.msra.mxu0 %v2336_v5  ;;  %1834 = vmatpush3.bf16.xpose.msra.mxu1 %v1833_v11  ;;  %v689_v57 = vand.u32 4294901760, %v641_v46  ;;  %v692_v49 = vand.u32 4294901760, %v644_v47  ;;  %v808_v50 = vand.u32 4294901760, %v2359_v43  ;;  %v600_v58 = vadd.f32 %v584_v44, %v504_v48  ;;  %s422_s16 = scalar_lea.vmem [#allocation3], %s1482_s10 }
  0x42   : > { %1814 = vmatprep.subr.bf16.mxu0 %v2121_v0  ;;  %1835 = vmatprep.subr.bf16.mxu1 %v2121_v0  ;;  %v815_v60 = vand.u32 4294901760, %v2361_v45  ;;  %v601_v61 = vadd.f32 %v585_v51, %v505_v54  ;;  %v2374_v9 = vpack.c.bf16 %v686_v31, %v683_v27  ;;  %v1839_v10 = vpack.c.bf16 %v803_v56, %v796_v55  ;;  %v605_v51 = vld [vmem:[%s2615_s0] sm:$0xf]  ;;  %s1334_s17 = sshll.u32 %s422_s16, 4  ;;  %s2570_s17 = int_to_ptr.vmem [resolvable:$true] %s1334_s17 }
  0x43   : > { %v2376_v11 = vsub.f32 %v641_v46, %v689_v57  ;;  %v2378_v14 = vsub.f32 %v644_v47, %v692_v49  ;;  %v809_v16 = vsub.f32 %v2359_v43, %v808_v50  ;;  %v647_v20 = vsel %vm606_vm1, %v600_v58, 0  ;;  %p2048_p2 = scmp.lt.s32.totalorder %s2570_s17, %s2046_s22 }
  0x44   : > { %v816_v21 = vsub.f32 %v2361_v45, %v815_v60  ;;  %v650_v22 = vsel %vm606_vm1, %v601_v61, 0  ;;  %v2390_v27 = vpack.c.bf16 %v759_v18, %v752_v13  ;;  %v2396_v31 = vpack.c.bf16 %v773_v30, %v766_v24 }
  0x45   : > { %v2402_v32 = vpack.c.bf16 %v787_v53, %v780_v52  ;;  %v2404_v33 = vpack.c.bf16 %v801_v23, %v794_v19  ;;  %v695_v34 = vand.u32 4294901760, %v647_v20  ;;  %v698_v36 = vand.u32 4294901760, %v650_v22 }
  0x46   : > { %v2036_v59 = vpop.eup %2035  ;;  %v822_v37 = vand.u32 4294901760, %v2376_v11  ;;  %v829_v13 = vand.u32 4294901760, %v2378_v14  ;;  %v2408_v18 = vpack.c.bf16 %v815_v60, %v808_v50  ;;  %v810_v24 = vand.u32 4294901760, %v809_v16 }
  0x47   : > { %v2038_v62 = vpop.eup %2037  ;;  %v586_v15 = vmul.f32 %v2036_v59, %v570_v4  ;;  %v817_v30 = vand.u32 4294901760, %v816_v21  ;;  %v2415_v53 = vpack.c.bf16 %v692_v49, %v689_v57  ;;  %v2417_v19 = vsub.f32 %v647_v20, %v695_v34 }
  0x48   : > { %v587_v25 = vmul.f32 %v2038_v62, %v571_v8  ;;  %v2413_v52 = vpack.c.bf16 %v829_v13, %v822_v37  ;;  %v2419_v23 = vsub.f32 %v650_v22, %v698_v36  ;;  %v830_v46 = vsub.f32 %v2378_v14, %v829_v13 }
  0x49   : > { %1816 = vmatpush3.bf16.xpose.msra.mxu0 %v2357_v41  ;;  %1837 = vmatpush3.bf16.xpose.msra.mxu1 %v1836_v42  ;;  %v602_v38 = vadd.f32 %v586_v15, %v506_v26  ;;  %v823_v42 = vsub.f32 %v2376_v11, %v822_v37  ;;  %v1842_v44 = vpack.c.bf16 %v817_v30, %v810_v24  ;;  %v836_v56 = vand.u32 4294901760, %v2417_v19 }
  0x4a   : > { %1817 = vmatprep.subr.bf16.mxu0 %v2121_v0  ;;  %1838 = vmatprep.subr.bf16.mxu1 %v2121_v0  ;;  %v603_v40 = vadd.f32 %v587_v25, %v507_v28  ;;  %v843_v57 = vand.u32 4294901760, %v2419_v23  ;;  %v831_v50 = vand.u32 4294901760, %v830_v46  ;;  %v608_v58 = vsel %vm606_vm1, %v605_v51, 0 }
  0x4b   : > { %v653_v47 = vsel %vm606_vm1, %v602_v38, 0  ;;  %v824_v49 = vand.u32 4294901760, %v823_v42  ;;  %v2440_v62 = vand.u32 4294901760, %v608_v58  ;;  %v2442_v4 = vpack.c.bf16 %v698_v36, %v695_v34 }
  0x4c   : > { %v656_v48 = vsel %vm606_vm1, %v603_v40, 0  ;;  %v701_v54 = vand.u32 4294901760, %v653_v47  ;;  %v2434_v59 = vpack.c.bf16 %v843_v57, %v836_v56  ;;  %v844_v16 = vsub.f32 %v2419_v23, %v843_v57 }
  0x4d   : > { %v704_v55 = vand.u32 4294901760, %v656_v48  ;;  %v1845_v8 = vpack.c.bf16 %v831_v50, %v824_v49  ;;  %v2447_v20 = vsub.f32 %v608_v58, %v2440_v62  ;;  %v1857_v46 = vpack.c.bf16 %v2290_v17, %v2283_v12 }
  0x4e   : > { %v2436_v60 = vsub.f32 %v653_v47, %v701_v54  ;;  %v845_v25 = vand.u32 4294901760, %v844_v16  ;;  %v1866_v12 = vpack.c.bf16 %v2361_v45, %v2359_v43  ;;  %v1869_v17 = vpack.c.bf16 %v2378_v14, %v2376_v11 }
  0x4f   : > { %v2438_v61 = vsub.f32 %v656_v48, %v704_v55  ;;  %v741_v28 = vand.u32 4294901760, %v2447_v20  ;;  %v2457_v34 = vpack.c.bf16 %v704_v55, %v701_v54  ;;  %v1304_v54 = vld [vmem:[%s480_s30] sm:$0x1] }
  0x50   : > { %v850_v21 = vand.u32 4294901760, %v2436_v60 }
  0x51   : > { %1819 = vmatpush3.bf16.xpose.msra.mxu0 %v2374_v9  ;;  %1840 = vmatpush3.bf16.xpose.msra.mxu1 %v1839_v10  ;;  %v837_v10 = vsub.f32 %v2417_v19, %v836_v56  ;;  %v857_v22 = vand.u32 4294901760, %v2438_v61  ;;  %v742_v24 = vsub.f32 %v2447_v20, %v741_v28 }
  0x52   : > { %1820 = vmatprep.subr.bf16.mxu0 %v2121_v0  ;;  %1841 = vmatprep.subr.bf16.mxu1 %v2121_v0  ;;  %v851_v37 = vsub.f32 %v2436_v60, %v850_v21 }
  0x53   : > { %v838_v15 = vand.u32 4294901760, %v837_v10  ;;  %v2454_v26 = vpack.c.bf16 %v857_v22, %v850_v21  ;;  %v858_v13 = vsub.f32 %v2438_v61, %v857_v22  ;;  %v743_v40 = vand.u32 4294901760, %v742_v24 }
  0x54   : > { %v852_v30 = vand.u32 4294901760, %v851_v37 }
  0x55   : > { %v1848_v36 = vpack.c.bf16 %v845_v25, %v838_v15  ;;  %v859_v38 = vand.u32 4294901760, %v858_v13 }
  0x57   : > { %v1851_v42 = vpack.c.bf16 %v859_v38, %v852_v30 }
  0x59   : > { %1822 = vmatpush3.bf16.xpose.msra.mxu0 %v2415_v53  ;;  %1843 = vmatpush3.bf16.xpose.msra.mxu1 %v1842_v44  ;;  %v1854_v44 = vpack.c.bf16 %v2276_v7, %v2271_v63  ;;  %v1860_v63 = vpack.c.bf16 %v2308_v35, %v2304_v29  ;;  %v1863_v7 = vpack.c.bf16 %v2334_v3, %v2332_v2 }
  0x5a   : > { %1823 = vmatprep.subr.bf16.mxu0 %v2121_v0  ;;  %1844 = vmatprep.subr.bf16.mxu1 %v2121_v0  ;;  %v1872_v29 = vpack.c.bf16 %v2419_v23, %v2417_v19  ;;  %v1875_v35 = vpack.c.bf16 %v2438_v61, %v2436_v60 }
  0x61   : > { %1825 = vmatpush3.bf16.xpose.msra.mxu0 %v2442_v4  ;;  %1846 = vmatpush3.bf16.xpose.msra.mxu1 %v1845_v8 }
  0x62   : > { %1826 = vmatprep.subr.bf16.mxu0 %v2121_v0  ;;  %1847 = vmatprep.subr.bf16.mxu1 %v2121_v0 }
  0x69   : > { %1828 = vmatpush3.bf16.xpose.msra.mxu0 %v2457_v34  ;;  %1849 = vmatpush3.bf16.xpose.msra.mxu1 %v1848_v36 }
  0x6a   : > { %1850 = vmatprep.subr.bf16.mxu1 %v2121_v0  ;;  %1853 = vmatprep.subr.bf16.mxu0 %v2121_v0 }
  0x70   : > { %1628 = vmatmul.mubr.f32.vlgmr.msra.gmra.mrb[0].mxu0 %v743_v40 }
  0x71   : > { %1852 = vmatpush3.bf16.xpose.msra.mxu1 %v1851_v42  ;;  %1855 = vmatpush3.bf16.xpose.msra.mxu0 %v1854_v44 }
  0x72   : > { %1856 = vmatprep.subr.bf16.mxu0 %v2121_v0  ;;  %1877 = vmatprep.subr.bf16.mxu1 %v2121_v0 }
  0x73   : > { %1697 = vmatprep.mubr.msk.f32.mxu0 %vm2123_vm0, %v2122_v1 }
  0x78   : > { %1663 = vmatmul.mubr.f32.vlgmr.msra.gmra.mrb[0].mxu1 %v2440_v62 }
  0x79   : > { %1858 = vmatpush3.bf16.xpose.msra.mxu0 %v1857_v46  ;;  %1879 = vmatpush3.bf16.xpose.msra.mxu1 %v2274_v6 }
  0x7a   : > { %1859 = vmatprep.subr.bf16.mxu0 %v2121_v0  ;;  %1880 = vmatprep.subr.bf16.mxu1 %v2121_v0 }
  0x7b   : > { %1732 = vmatprep.mubr.msk.f32.mxu1 %vm2123_vm0, %v2122_v1 }
  0x81   : > { %1861 = vmatpush3.bf16.xpose.msra.mxu0 %v1860_v63  ;;  %1882 = vmatpush3.bf16.xpose.msra.mxu1 %v2310_v39 }
  0x82   : > { %1862 = vmatprep.subr.bf16.mxu0 %v2121_v0  ;;  %1883 = vmatprep.subr.bf16.mxu1 %v2121_v0 }
  0x89   : > { %1864 = vmatpush3.bf16.xpose.msra.mxu0 %v1863_v7  ;;  %1885 = vmatpush3.bf16.xpose.msra.mxu1 %v2336_v5 }
  0x8a   : > { %1865 = vmatprep.subr.bf16.mxu0 %v2121_v0  ;;  %1886 = vmatprep.subr.bf16.mxu1 %v2121_v0 }
  0x91   : > { %1867 = vmatpush3.bf16.xpose.msra.mxu0 %v1866_v12  ;;  %1888 = vmatpush3.bf16.xpose.msra.mxu1 %v2357_v41 }
  0x92   : > { %1868 = vmatprep.subr.bf16.mxu0 %v2121_v0  ;;  %1889 = vmatprep.subr.bf16.mxu1 %v2121_v0 }
  0x99   : > { %1870 = vmatpush3.bf16.xpose.msra.mxu0 %v1869_v17  ;;  %1891 = vmatpush3.bf16.xpose.msra.mxu1 %v2374_v9 }
  0x9a   : > { %1871 = vmatprep.subr.bf16.mxu0 %v2121_v0  ;;  %1892 = vmatprep.subr.bf16.mxu1 %v2121_v0 }
  0xa1   : > { %1873 = vmatpush3.bf16.xpose.msra.mxu0 %v1872_v29  ;;  %1894 = vmatpush3.bf16.xpose.msra.mxu1 %v2415_v53 }
  0xa2   : > { %1874 = vmatprep.subr.bf16.mxu0 %v2121_v0  ;;  %1895 = vmatprep.subr.bf16.mxu1 %v2121_v0 }
  0xa9   : > { %1876 = vmatpush3.bf16.xpose.msra.mxu0 %v1875_v35  ;;  %1897 = vmatpush3.bf16.xpose.msra.mxu1 %v2442_v4 }
  0xaa   : > { %1898 = vmatprep.subr.bf16.mxu1 %v2121_v0  ;;  %1901 = vmatprep.subr.bf16.mxu0 %v2121_v0 }
  0xb0   : > { %1698 = vmatmul.mubr.f32.vlgmr.msra.gmra.mrb[2].mxu0 %v2447_v20 }
  0xb1   : > { %1900 = vmatpush3.bf16.xpose.msra.mxu1 %v2457_v34  ;;  %1903 = vmatpush3.bf16.xpose.msra.mxu0 %v2390_v27 }
  0xb2   : > { %1904 = vmatprep.subr.bf16.mxu0 %v2121_v0  ;;  %1925 = vmatprep.subr.bf16.mxu1 %v2121_v0 }
  0xb3   : > { %1767 = vmatprep.mubr.msk.f32.mxu0 %vm2123_vm0, %v2122_v1 }
  0xb8   : > { %1733 = vmatmul.mubr.f32.vlgmr.msra.gmra.mrb[2].mxu1 %v741_v28 }
  0xb9   : > { %1906 = vmatpush3.bf16.xpose.msra.mxu0 %v2396_v31  ;;  %1927 = vmatpush3.bf16.xpose.msra.mxu1 %v2274_v6 }
  0xba   : > { %1907 = vmatprep.subr.bf16.mxu0 %v2121_v0  ;;  %1928 = vmatprep.subr.bf16.mxu1 %v2121_v0 }
  0xbb   : > { %1802 = vmatprep.mubr.msk.f32.mxu1 %vm2123_vm0, %v2122_v1 }
  0xc1   : > { %1909 = vmatpush3.bf16.xpose.msra.mxu0 %v2402_v32  ;;  %1930 = vmatpush3.bf16.xpose.msra.mxu1 %v2310_v39 }
  0xc2   : > { %1910 = vmatprep.subr.bf16.mxu0 %v2121_v0  ;;  %1931 = vmatprep.subr.bf16.mxu1 %v2121_v0 }
  0xc9   : > { %1912 = vmatpush3.bf16.xpose.msra.mxu0 %v2404_v33  ;;  %1933 = vmatpush3.bf16.xpose.msra.mxu1 %v2336_v5  ;;  %v1313_v33 = vlaneseq }
  0xca   : > { %1913 = vmatprep.subr.bf16.mxu0 %v2121_v0  ;;  %1934 = vmatprep.subr.bf16.mxu1 %v2121_v0 }
  0xcb   : > { %v1314_v51 = vshrl.u32 %v1313_v33, 7 }
  0xcd   : > { %v1315_v57 = vsub.s32 0, %v1314_v51 }
  0xd1   : > { %1915 = vmatpush3.bf16.xpose.msra.mxu0 %v2408_v18  ;;  %1936 = vmatpush3.bf16.xpose.msra.mxu1 %v2357_v41 }
  0xd2   : > { %1916 = vmatprep.subr.bf16.mxu0 %v2121_v0  ;;  %1937 = vmatprep.subr.bf16.mxu1 %v2121_v0 }
  0xd9   : > { %1918 = vmatpush3.bf16.xpose.msra.mxu0 %v2413_v52  ;;  %1939 = vmatpush3.bf16.xpose.msra.mxu1 %v2374_v9  ;;  %v1308_v52 = vld [vmem:[%s486_s21] sm:$0x1]  ;;  %s2041_s21 = scalar_lea.vmem %s2570_s17, 64 }
  0xda   : > { %1919 = vmatprep.subr.bf16.mxu0 %v2121_v0  ;;  %1940 = vmatprep.subr.bf16.mxu1 %v2121_v0  ;;  %p2042_p13 = scmp.ne.s32.totalorder %s2570_s17, %s2041_s21  ;;  %p2049_p3 = scmp.lt.s32.totalorder %s2047_s23, %s2041_s21 }
  0xdc   : > { %p2043_p0 = pnand %p2042_p13, %p2205_p4  ;;  %p2050_p5 = por %p2049_p3, %p2048_p2 }
  0xde   : > { %p2044_p1 = pneg %p2043_p0 }
  0xe0   : > { %p2051_p6 = pnand %p2050_p5, %p2044_p1 }
  0xe1   : > { %1921 = vmatpush3.bf16.xpose.msra.mxu0 %v2434_v59  ;;  %1942 = vmatpush3.bf16.xpose.msra.mxu1 %v2415_v53  ;;  %v604_v53 = vld [vmem:[#allocation2] sm:$0xf] }
  0xe2   : > { %1922 = vmatprep.subr.bf16.mxu0 %v2121_v0  ;;  %1943 = vmatprep.subr.bf16.mxu1 %v2121_v0 }
  0xe9   : > { %1924 = vmatpush3.bf16.xpose.msra.mxu0 %v2454_v26  ;;  %1945 = vmatpush3.bf16.xpose.msra.mxu1 %v2442_v4 }
  0xea   : > { %1946 = vmatprep.subr.bf16.mxu1 %v2121_v0  ;;  %v1305_v0 = vld [vmem:[%s483_s18] sm:$0x1] }
  0xeb   : > { %v1306_v14 = vmul.f32 1.442695, %v1305_v0 }
  0xed   : > { %2039 = vpow2.f32 %v1306_v14 }
  0xf0   : > { %1768 = vmatmul.mubr.f32.vlgmr.msra.gmra.mrb[4].mxu0 %v2440_v62 }
  0xf1   : > { %1948 = vmatpush3.bf16.xpose.msra.mxu1 %v2457_v34 }
  0xf7   : > { %v2040_v18 = vpop.eup %2039 }
  0xf8   : > { %1803 = vmatmul.mubr.f32.vlgmr.msra.gmra.mrb[4].mxu1 %v2440_v62  ;;  %v1309_v48 = vmul.f32 %v2040_v18, %v1308_v52 }
  0xfa   : > { %v1310_v56 = vadd.f32 %v1309_v48, %v1304_v54 }
  0xfc   : > { %v1316_v49 = vrot.slane %v1310_v56, %v1315_v57 }
 0x143   : > { %v745_v1 = vpop.f32.mrb[0].mxu0 }
 0x144   : > { %v1629_v6 = vpop.f32.mrb[1].mxu0 }
 0x14b   : > { %v896_v39 = vpop.f32.mrb[0].mxu1 }
 0x14c   : > { %v897_v2 = vadd.f32 %v896_v39, %v745_v1  ;;  %v1664_v3 = vpop.f32.mrb[1].mxu1 }
 0x183   : > { %v1000_v5 = vpop.f32.mrb[2].mxu0 }
 0x184   : > { %v1001_v41 = vadd.f32 %v1000_v5, %v897_v2  ;;  %v1699_v43 = vpop.f32.mrb[3].mxu0 }
 0x18b   : > { %v1089_v45 = vpop.f32.mrb[2].mxu1 }
 0x18c   : > { %v1090_v9 = vadd.f32 %v1089_v45, %v1001_v41  ;;  %v1734_v11 = vpop.f32.mrb[3].mxu1 }
 0x1c3   : > { %v1208_v27 = vpop.f32.mrb[4].mxu0 }
 0x1c4   : > { %v1209_v31 = vadd.f32 %v1208_v27, %v1090_v9  ;;  %v1769_v32 = vpop.f32.mrb[5].mxu0 }
 0x1cb   : > { %v1295_v19 = vpop.f32.mrb[4].mxu1 }
 0x1cc   : > { %v1296_v23 = vadd.f32 %v1295_v19, %v1209_v31  ;;  %v1804_v47 = vpop.f32.mrb[5].mxu1 }
 0x1ce   : > { %v1299_v55 = vadd.f32 %v1296_v23, %v604_v53 }
 0x1d0   : > { %1300 = vst [vmem:[#allocation2] sm:$0xf] %v1299_v55 }
 0x1d7   : > { %v1311_v50 = vld [vmem:[#allocation2] sm:$0xf] }
 0x1d8   : > { %v1318_v58 = vadd.f32 %v1316_v49, %v1311_v50 }
 0x1da   : > { %1319 = vst [vmem:[%s422_s16] sm:$0xf] %v1318_v58 }
 0x1db   : > { %2054 = shalt.err (!%p2051_p6)
}
 0x1dc   : > { %s2055_s30 = scalar_lea.hbm %s2568_s19, 64  ;;  %s2059_s12 = scalar_lea.hbm %s2622_s7, 128 }
 0x1dd   : > { %p2056_p7 = scmp.ne.s32.totalorder %s2568_s19, %s2055_s30  ;;  %p2060_p11 = scmp.lt.u32.totalorder %s2568_s19, %s2622_s7 }
 0x1de   : > { %p2061_p12 = scmp.lt.u32.totalorder %s2059_s12, %s2055_s30  ;;  %p2063_p0 = scmp.lt.u32.totalorder %s2055_s30, %s2568_s19 }
 0x1df   : > { %p2057_p9 = pnand %p2056_p7, %p2205_p4 }
 0x1e0   : > { %p2062_p13 = por %p2061_p12, %p2060_p11 }
 0x1e1   : > { %p2058_p10 = pneg %p2057_p9 }
 0x1e2   : > { %p2064_p1 = por %p2063_p0, %p2062_p13 }
 0x1e4   : > { %p2065_p2 = pnand %p2064_p1, %p2058_p10 }
 0x1e6   : > { %2068 = shalt.err (!%p2065_p2)
}
 0x1e7   : > { %1949 = dma.vmem_to_hbm [thread:$0]  (%p2205_p4), %s2570_s17, 64, %s2568_s19, %s1321_s20  }
 0x1e8 PF: > { %p1955_p3 = scmp.ge.s32.totalorder %s2119_s29, 2  ;;  %s1346_s18 = sand.u32 1, %s2099_s24  }
 0x1e9   : > { %s1347_s21 = scalar_lea.sflag [#allocation4], %s1346_s18 }
 0x1ea   : > { %p1952_p5 = pnand %p1955_p3, %p2212_p8 }
 0x1ec   : > { %2094 = dma.done.wait (!%p1952_p5), %s1347_s21, 64  }
 0x1ed   : > { %2096 = vsyncadd (!%p1952_p5), %s1347_s21, 4294967232  ;;  %s20_s29 = sadd.s32 1, %s2119_s29   ;;  %s2625_s24 = smov %s2103_s25 }
 0x1ee   : > { %p17_p6 = scmp.ge.s32.totalorder %s20_s29, 4   ;;  %s2626_s25 = smov %s2107_s26 }
 0x1ef   : > { %s2627_s26 = smov %s2218_s14  ;;  %s2628_s27 = smov %s2115_s28 }
 0x1f0   : > { %s2629_s28 = smov %s2631_s9  ;;  %19 = sbr.rel (!%p17_p6) target bundleno = 4 (0x4), region = 109 }
 0x1f7   :  { %1352 = vsyncpa [#allocation4], 1 }
 0x1f8   :  { %1354 = vsyncpa [#allocation4 + $0x1], 1 }

</bundles_post_ra>
